<compile_context>
chip_gen: v6e
topology: v6e:2x2x1
jax: 0.10.0
libtpu: 0.0.40
codegen_flags: <defaults>
</compile_context>

<pallas_src>
import jax
import jax.numpy as jnp
import numpy as np
from jax.experimental import pallas as pl
from jax.experimental.pallas import tpu as pltpu


def _round_up(x, m):
    return ((x + m - 1) // m) * m


def _feature_align():
    """256 on v6e/v7x (256x256 MXU tiles), 128 on earlier generations (128x128 MXU)."""
    try:
        kind = jax.devices()[0].device_kind.lower()
    except Exception:
        return 128
    return 128 if any(t in kind for t in ("v2", "v3", "v4", "v5")) else 256


def _pick_tn(fp, target=512):
    """Largest multiple of 128 that divides fp and is <= target (bounds w2 VMEM residency)."""
    best, t = 128, 128
    while t <= min(fp, target):
        if fp % t == 0:
            best = t
        t += 128
    return best


def _vmem_limit_bytes(tb, fin, fp, tn, out_itemsize):
    """Budget from actual (double-buffered) residency + scratch + f32 temporaries, with headroom."""
    dbl = 2  # Pallas double-buffers pipelined operands by default
    weights = dbl * ((fin * fp + fin * tn + fp * tn) * 2 + (fp + 2 * tn) * 4)
    io = dbl * (tb * fin * 4 + tb * tn * out_itemsize)
    scratch = tb * fp * 2                    # bf16 h cache
    temps = tb * fp * 4 + 2 * tb * tn * 4    # z (at n==0) and y/r f32 temporaries
    need = weights + io + scratch + temps
    return int(min(max(need * 5 // 4 + (4 << 20), 32 << 20), 100 << 20))


def residual_block_kernel(x_ref, w1_ref, b1_ref, wr_ref, br_ref, w2_ref, b2_ref,
                          o_ref, h_ref):
    # x_ref:  (tb, Fin)  f32   (cast to bf16 in VMEM -- no wrapper-side HBM round trip)
    # w1_ref: (Fin, Fp)  bf16  = w1 * bn1_scale            b1_ref: (1, Fp) f32 = bn1-folded bias
    # wr_ref: (Fin, tn)  bf16  residual Linear (n-tiled)   br_ref: (1, tn) f32
    # w2_ref: (Fp, tn)   bf16  = w2 * bn2_scale (n-tiled)  b2_ref: (1, tn) f32
    # o_ref:  (tb, tn)                                      h_ref: (tb, Fp) bf16 scratch
    n = pl.program_id(1)
    xb = x_ref[...].astype(jnp.bfloat16)

    @pl.when(n == 0)
    def _():
        # Linear1 + folded BN1 + ReLU (Dropout = identity, eval); cached for all n-tiles of this
        # batch tile. Padded feature columns are exact zeros by construction.
        z = jnp.dot(xb, w1_ref[...], preferred_element_type=jnp.float32) + b1_ref[...]
        h_ref[...] = jnp.maximum(z, 0.0).astype(jnp.bfloat16)

    # Residual Linear for this output-column tile (f32 accumulation).
    r = jnp.dot(xb, wr_ref[...], preferred_element_type=jnp.float32) + br_ref[...]
    # Linear2 + folded BN2 + ReLU for this output-column tile (Dropout = identity, eval).
    y = jnp.dot(h_ref[...], w2_ref[...], preferred_element_type=jnp.float32) + b2_ref[...]
    o_ref[...] = (jnp.maximum(y, 0.0) + r).astype(o_ref.dtype)


def residual_block(x, params, *, tile_b=256, tile_n=512, out_dtype=None):
    """x: [B, in_features] f32 -> [B, out_features] (eval-mode ResidualBlock forward)."""
    B, Fin = x.shape
    Fp = params["w2"].shape[0]          # padded out_features (multiple of 128/256)
    Fout = params["out_features"]
    if out_dtype is None:
        out_dtype = x.dtype             # pass jnp.bfloat16 to halve writeback when store-bound

    # Output-feature tiling: bounds w2/out VMEM residency independent of Fout.
    tn = _pick_tn(Fp, tile_n)
    nn = Fp // tn

    # Batch tiling: no padding of x; Pallas clips the partial last tile. Ensure >= 2 batch tiles
    # when possible so the "parallel" axis can shard across TensorCores (v7x megacore).
    tb = min(tile_b, _round_up(B, 8))
    if B > 8 and pl.cdiv(B, tb) < 2:
        tb = _round_up(pl.cdiv(B, 2), 8)
    nb = pl.cdiv(B, tb)

    vmem_limit = _vmem_limit_bytes(tb, Fin, Fp, tn, jnp.dtype(out_dtype).itemsize)

    out = pl.pallas_call(
        residual_block_kernel,
        out_shape=jax.ShapeDtypeStruct((B, Fp), out_dtype),
        grid_spec=pltpu.PrefetchScalarGridSpec(
            num_scalar_prefetch=0,
            grid=(nb, nn),
            in_specs=[
                pl.BlockSpec((tb, Fin), lambda i, n: (i, 0)),   # x (f32, cast in-kernel)
                pl.BlockSpec((Fin, Fp), lambda i, n: (0, 0)),   # w1 * bn1_scale (resident)
                pl.BlockSpec((1, Fp), lambda i, n: (0, 0)),     # folded bias1 (resident)
                pl.BlockSpec((Fin, tn), lambda i, n: (0, n)),   # residual weight (n-tiled)
                pl.BlockSpec((1, tn), lambda i, n: (0, n)),     # residual bias   (n-tiled)
                pl.BlockSpec((Fp, tn), lambda i, n: (0, n)),    # w2 * bn2_scale  (n-tiled)
                pl.BlockSpec((1, tn), lambda i, n: (0, n)),     # folded bias2    (n-tiled)
            ],
            out_specs=pl.BlockSpec((tb, tn), lambda i, n: (i, n)),
            scratch_shapes=[pltpu.VMEM((tb, Fp), jnp.bfloat16)],  # h cache, reused across n
        ),
        compiler_params=pltpu.CompilerParams(
            dimension_semantics=("parallel", "arbitrary"),
            vmem_limit_bytes=vmem_limit,
        ),
    )(x, params["w1"], params["b1"], params["wr"], params["br"],
      params["w2"], params["b2"])

    return out[:, :Fout]


def make_params(key, in_features, out_features, eps=1e-5, feature_align=None):
    """Synthetic PyTorch-equivalent parameters; BN (eval) + scale folds and padding done OFFLINE."""
    if feature_align is None:
        feature_align = _feature_align()
    ks = jax.random.split(key, 16)

    def linear(kw, kb, fin, fout):
        # PyTorch nn.Linear stores weight as (out, in); we keep it (in, out) for the kernel.
        w = jax.random.normal(kw, (fin, fout), jnp.float32) * (1.0 / np.sqrt(fin))
        b = jax.random.normal(kb, (fout,), jnp.float32) * 0.1
        return w, b

    w1, b1 = linear(ks[0], ks[1], in_features, out_features)
    w2, b2 = linear(ks[2], ks[3], out_features, out_features)
    wr, br = linear(ks[4], ks[5], in_features, out_features)

    def bn(kg, kb, km, kv, f):
        gamma = 1.0 + 0.1 * jax.random.normal(kg, (f,), jnp.float32)
        beta = 0.1 * jax.random.normal(kb, (f,), jnp.float32)
        rmean = 0.1 * jax.random.normal(km, (f,), jnp.float32)
        rvar = jnp.abs(1.0 + 0.1 * jax.random.normal(kv, (f,), jnp.float32))
        scale = gamma / jnp.sqrt(rvar + eps)
        shift = beta - scale * rmean
        return scale, shift

    s1, sh1 = bn(ks[6], ks[7], ks[8], ks[9], out_features)
    s2, sh2 = bn(ks[10], ks[11], ks[12], ks[13], out_features)

    # Fold BN scale into weight columns; BN shift + linear bias into one bias vector.
    w1s = w1 * s1[None, :]
    b1f = s1 * b1 + sh1
    w2s = w2 * s2[None, :]
    b2f = s2 * b2 + sh2

    # Pad the output-feature dim to the MXU-friendly granularity (zero padding keeps math exact).
    Fp = _round_up(out_features, feature_align)
    pad_c = Fp - out_features
    pad_cols = lambda a: jnp.pad(a, ((0, 0), (0, pad_c)))
    pad_vec = lambda v: jnp.pad(v, (0, pad_c))[None, :]

    return {
        "w1": pad_cols(w1s).astype(jnp.bfloat16),                       # (Fin, Fp) bf16
        "b1": pad_vec(b1f),                                             # (1, Fp)   f32
        "wr": pad_cols(wr).astype(jnp.bfloat16),                        # (Fin, Fp) bf16
        "br": pad_vec(br),                                              # (1, Fp)   f32
        "w2": jnp.pad(w2s, ((0, pad_c), (0, pad_c))).astype(jnp.bfloat16),  # (Fp, Fp) bf16
        "b2": pad_vec(b2f),                                             # (1, Fp)   f32
        "out_features": out_features,
        # unfolded copies kept only for the reference check
        "ref": {"w1": w1, "b1": b1, "s1": s1, "sh1": sh1,
                "w2": w2, "b2": b2, "s2": s2, "sh2": sh2,
                "wr": wr, "br": br},
    }


def reference(x, p):
    """Pure-JAX eval-mode reference mirroring the kernel's bf16 weight/activation rounding."""
    r = p["ref"]
    bf = lambda a: a.astype(jnp.bfloat16).astype(jnp.float32)
    xb = bf(x)
    w1s = bf(r["w1"] * r["s1"][None, :])
    w2s = bf(r["w2"] * r["s2"][None, :])
    wr = bf(r["wr"])
    b1f = r["s1"] * r["b1"] + r["sh1"]
    b2f = r["s2"] * r["b2"] + r["sh2"]

    h = bf(jnp.maximum(xb @ w1s + b1f, 0.0))
    y = jnp.maximum(h @ w2s + b2f, 0.0)
    return y + (xb @ wr + r["br"])


if __name__ == "__main__":
    key = jax.random.PRNGKey(0)
    kx, kp = jax.random.split(key)

    B, Fin, Fout = 16, 32, 64
    x = jax.random.normal(kx, (B, Fin), jnp.float32)
    params = make_params(kp, Fin, Fout)

    out = jax.block_until_ready(residual_block(x, params))

    ref = reference(x, params)
    np.testing.assert_allclose(np.asarray(out), np.asarray(ref), rtol=5e-3, atol=5e-3)

    print("KERNEL_OK")
</pallas_src>

<mosaic_0001>
module attributes {stable_mosaic.version = 11 : i64} {
  func.func @residual_block_kernel(%arg0: i32, %arg1: i32, %arg2: memref<8x32xf32, #tpu.memory_space<vmem>>, %arg3: memref<32x256xbf16, #tpu.memory_space<vmem>>, %arg4: memref<1x256xf32, #tpu.memory_space<vmem>>, %arg5: memref<32x256xbf16, #tpu.memory_space<vmem>>, %arg6: memref<1x256xf32, #tpu.memory_space<vmem>>, %arg7: memref<256x256xbf16, #tpu.memory_space<vmem>>, %arg8: memref<1x256xf32, #tpu.memory_space<vmem>>, %arg9: memref<8x256xf32, #tpu.memory_space<vmem>>, %arg10: memref<8x256xbf16, #tpu.memory_space<vmem>>) attributes {dimension_semantics = [#tpu.dimension_semantics<parallel>, #tpu.dimension_semantics<arbitrary>], iteration_bounds = array<i64: 2, 1>, scalar_prefetch = 0 : i64, scratch_operands = 1 : i64, tpu.core_type = #tpu.core_type<tc>, window_params = [{transform_indices = @transform_0, window_bounds = array<i64: 8, 32>}, {pipeline_mode = #tpu.pipeline_mode<synchronous>, transform_indices = @transform_1, window_bounds = array<i64: 32, 256>}, {pipeline_mode = #tpu.pipeline_mode<synchronous>, transform_indices = @transform_2, window_bounds = array<i64: 1, 256>}, {transform_indices = @transform_3, window_bounds = array<i64: 32, 256>}, {transform_indices = @transform_4, window_bounds = array<i64: 1, 256>}, {transform_indices = @transform_5, window_bounds = array<i64: 256, 256>}, {transform_indices = @transform_6, window_bounds = array<i64: 1, 256>}, {transform_indices = @transform_7, window_bounds = array<i64: 8, 256>}]} {
    %c0 = arith.constant 0 : index
    %c0_0 = arith.constant 0 : index
    %0 = vector.load %arg2[%c0, %c0_0] : memref<8x32xf32, #tpu.memory_space<vmem>>, vector<8x32xf32>
    %1 = arith.truncf %0 : vector<8x32xf32> to vector<8x32xbf16>
    %c0_i32 = arith.constant 0 : i32
    %2 = arith.cmpi eq, %arg1, %c0_i32 : i32
    %3 = arith.extui %2 : i1 to i32
    %c0_i32_1 = arith.constant 0 : i32
    %4 = arith.cmpi ne, %3, %c0_i32_1 : i32
    scf.if %4 {
      %c0_16 = arith.constant 0 : index
      %c0_17 = arith.constant 0 : index
      %20 = vector.load %arg3[%c0_16, %c0_17] : memref<32x256xbf16, #tpu.memory_space<vmem>>, vector<32x256xbf16>
      %cst_18 = arith.constant dense<0.000000e+00> : vector<8x256xf32>
      %21 = tpu.matmul %1, %20, %cst_18 {dimension_numbers = #tpu.dot_dimension_numbers<[1], [0], [0], [1], [0, 0, 1, 1], [], []>} : vector<8x32xbf16>, vector<32x256xbf16>, vector<8x256xf32> -> vector<8x256xf32>
      %c0_19 = arith.constant 0 : index
      %c0_20 = arith.constant 0 : index
      %22 = vector.load %arg4[%c0_19, %c0_20] : memref<1x256xf32, #tpu.memory_space<vmem>>, vector<1x256xf32>
      %23 = vector.broadcast %22 : vector<1x256xf32> to vector<8x256xf32>
      %24 = arith.addf %21, %23 : vector<8x256xf32>
      %cst_21 = arith.constant 0.000000e+00 : f32
      %25 = vector.broadcast %cst_21 : f32 to vector<8x256xf32>
      %26 = arith.maximumf %24, %25 : vector<8x256xf32>
      %27 = arith.truncf %26 : vector<8x256xf32> to vector<8x256xbf16>
      %c0_22 = arith.constant 0 : index
      %c0_23 = arith.constant 0 : index
      %28 = vector.load %arg10[%c0_22, %c0_23] : memref<8x256xbf16, #tpu.memory_space<vmem>>, vector<8x256xbf16>
      tpu.vector_store %arg10[%c0_22, %c0_23], %27 {strides = array<i32>} : memref<8x256xbf16, #tpu.memory_space<vmem>>, vector<8x256xbf16>,
    } else {
    }
    %c0_2 = arith.constant 0 : index
    %c0_3 = arith.constant 0 : index
    %5 = vector.load %arg5[%c0_2, %c0_3] : memref<32x256xbf16, #tpu.memory_space<vmem>>, vector<32x256xbf16>
    %cst = arith.constant dense<0.000000e+00> : vector<8x256xf32>
    %6 = tpu.matmul %1, %5, %cst {dimension_numbers = #tpu.dot_dimension_numbers<[1], [0], [0], [1], [0, 0, 1, 1], [], []>} : vector<8x32xbf16>, vector<32x256xbf16>, vector<8x256xf32> -> vector<8x256xf32>
    %c0_4 = arith.constant 0 : index
    %c0_5 = arith.constant 0 : index
    %7 = vector.load %arg6[%c0_4, %c0_5] : memref<1x256xf32, #tpu.memory_space<vmem>>, vector<1x256xf32>
    %8 = vector.broadcast %7 : vector<1x256xf32> to vector<8x256xf32>
    %9 = arith.addf %6, %8 : vector<8x256xf32>
    %c0_6 = arith.constant 0 : index
    %c0_7 = arith.constant 0 : index
    %10 = vector.load %arg10[%c0_6, %c0_7] : memref<8x256xbf16, #tpu.memory_space<vmem>>, vector<8x256xbf16>
    %c0_8 = arith.constant 0 : index
    %c0_9 = arith.constant 0 : index
    %11 = vector.load %arg7[%c0_8, %c0_9] : memref<256x256xbf16, #tpu.memory_space<vmem>>, vector<256x256xbf16>
    %cst_10 = arith.constant dense<0.000000e+00> : vector<8x256xf32>
    %12 = tpu.matmul %10, %11, %cst_10 {dimension_numbers = #tpu.dot_dimension_numbers<[1], [0], [0], [1], [0, 0, 1, 1], [], []>} : vector<8x256xbf16>, vector<256x256xbf16>, vector<8x256xf32> -> vector<8x256xf32>
    %c0_11 = arith.constant 0 : index
    %c0_12 = arith.constant 0 : index
    %13 = vector.load %arg8[%c0_11, %c0_12] : memref<1x256xf32, #tpu.memory_space<vmem>>, vector<1x256xf32>
    %14 = vector.broadcast %13 : vector<1x256xf32> to vector<8x256xf32>
    %15 = arith.addf %12, %14 : vector<8x256xf32>
    %cst_13 = arith.constant 0.000000e+00 : f32
    %16 = vector.broadcast %cst_13 : f32 to vector<8x256xf32>
    %17 = arith.maximumf %15, %16 : vector<8x256xf32>
    %18 = arith.addf %17, %9 : vector<8x256xf32>
    %c0_14 = arith.constant 0 : index
    %c0_15 = arith.constant 0 : index
    %19 = vector.load %arg9[%c0_14, %c0_15] : memref<8x256xf32, #tpu.memory_space<vmem>>, vector<8x256xf32>
    tpu.vector_store %arg9[%c0_14, %c0_15], %18 {strides = array<i32>} : memref<8x256xf32, #tpu.memory_space<vmem>>, vector<8x256xf32>,
    return
  }
  func.func @transform_0(%arg0: i32, %arg1: i32) -> (i32, i32) {
    %c0_i32 = arith.constant 0 : i32
    %c0_i32_0 = arith.constant 0 : i32
    return %arg0, %c0_i32 : i32, i32
  }
  func.func @transform_1(%arg0: i32, %arg1: i32) -> (i32, i32) {
    %c0_i32 = arith.constant 0 : i32
    %c0_i32_0 = arith.constant 0 : i32
    %c0_i32_1 = arith.constant 0 : i32
    return %c0_i32, %c0_i32_0 : i32, i32
  }
  func.func @transform_2(%arg0: i32, %arg1: i32) -> (i32, i32) {
    %c0_i32 = arith.constant 0 : i32
    %c0_i32_0 = arith.constant 0 : i32
    %c0_i32_1 = arith.constant 0 : i32
    return %c0_i32, %c0_i32_0 : i32, i32
  }
  func.func @transform_3(%arg0: i32, %arg1: i32) -> (i32, i32) {
    %c0_i32 = arith.constant 0 : i32
    %c0_i32_0 = arith.constant 0 : i32
    return %c0_i32, %arg1 : i32, i32
  }
  func.func @transform_4(%arg0: i32, %arg1: i32) -> (i32, i32) {
    %c0_i32 = arith.constant 0 : i32
    %c0_i32_0 = arith.constant 0 : i32
    return %c0_i32, %arg1 : i32, i32
  }
  func.func @transform_5(%arg0: i32, %arg1: i32) -> (i32, i32) {
    %c0_i32 = arith.constant 0 : i32
    %c0_i32_0 = arith.constant 0 : i32
    return %c0_i32, %arg1 : i32, i32
  }
  func.func @transform_6(%arg0: i32, %arg1: i32) -> (i32, i32) {
    %c0_i32 = arith.constant 0 : i32
    %c0_i32_0 = arith.constant 0 : i32
    return %c0_i32, %arg1 : i32, i32
  }
  func.func @transform_7(%arg0: i32, %arg1: i32) -> (i32, i32) {
    %c0_i32 = arith.constant 0 : i32
    return %arg0, %arg1 : i32, i32
  }
}

</mosaic_0001>

<bundles_post_ra>
// kernel: tpu_custom_call.1
= control target key start
LH: loop header
LB: loop body
LE: loop exit
PB: predicated region body
PF: predicated region fallthrough
CT: control target
= control target key end

     0   :  { %s1676_s0 = inlined_call_operand.hbm [shape: f32[16,32], index: 0, kind: input, shape index: {}]   ;;  %s1677_s1 = inlined_call_operand.hbm [shape: bf16[32,256], index: 1, kind: input, shape index: {}]   ;;  %s1678_s2 = inlined_call_operand.vmem [shape: f32[1,256], index: 2, kind: input, shape index: {}]   ;;  %s1679_s3 = inlined_call_operand.hbm [shape: bf16[32,256], index: 3, kind: input, shape index: {}]   ;;  %s1680_s4 = inlined_call_operand.vmem [shape: f32[1,256], index: 4, kind: input, shape index: {}]   ;;  %s1681_s5 = inlined_call_operand.hbm [shape: bf16[256,256], index: 5, kind: input, shape index: {}]   ;;  %s1682_s6 = inlined_call_operand.vmem [shape: f32[1,256], index: 6, kind: input, shape index: {}]   ;;  %s1683_s7 = inlined_call_operand.hbm [shape: f32[16,256], index: 7, kind: output, shape index: {}]  }
   0x1   :  { %1688 = sst [smem:[#allocation16_spill]] %s1677_s1 }
   0x2   :  { %1689 = sst [smem:[#allocation17_spill]] %s1679_s3 }
   0x3   :  { %1690 = sst [smem:[#allocation18_spill]] %s1681_s5 }
   0x4   :  { %12 = vsyncpa [#allocation4], 0 }
   0x5   :  { %14 = vsyncpa [#allocation4 + $0x1], 0 }
   0x6   :  { %15 = vsyncpa [#allocation7], 0 }
   0x7   :  { %16 = vsyncpa [#allocation10], 0 }
   0x8   :  { %17 = vsyncpa [#allocation5], 0 }
   0x9   :  { %19 = vsyncpa [#allocation5 + $0x1], 0  ;;  %s1474_s24 = smov 0   ;;  %s1476_s25 = smov 0  }
   0xa   :  { %s1478_s26 = smov 0   ;;  %s1480_s27 = smov 0  }
   0xb   :  { %s1482_s28 = smov 0   ;;  %s1484_s29 = smov 0  }
   0xc LB: > { %s1003_s30 = sadd.s32 4294967295, %s1424_s29   ;;  %s1004_s8 = sadd.s32 4294967294, %s1424_s29   ;;  %s1424_s29 = sphi %s1484_s29, %s25_s29   ;;  %s1420_s28 = sphi %s1482_s28, %s1711_s28   ;;  %s1416_s27 = sphi %s1480_s27, %s1710_s27   ;;  %s1412_s26 = sphi %s1478_s26, %s1709_s26   ;;  %s1408_s25 = sphi %s1476_s25, %s1708_s25   ;;  %s1404_s24 = sphi %s1474_s24, %s1707_s24  }
   0xd   : > { %p57_p0 = scmp.ne.s32.totalorder %s1408_s25, %s1404_s24  ;;  %p1508_p1 = scmp.eq.s32.totalorder %s1003_s30, 0 }
   0xe   : > { %p1512_p2 = scmp.eq.s32.totalorder %s1003_s30, 1  ;;  %p235_p3 = scmp.eq.s32.totalorder %s1004_s8, 1 }
   0xf   : > { %s1691_s9 = scalar_select %p1508_p1, 1, 0 }
  0x10   : > { %p1518_p4 = por %p1508_p1, %p57_p0  ;;  %p1005_p5 = scmp.ge.s32.totalorder %s1424_s29, 1 }
  0x11   : > { %p1523_p6 = por %p235_p3, %p57_p0  ;;  %p242_p7 = scmp.lt.s32.totalorder %s1424_s29, 3 }
  0x12   : > { %s1693_s11 = scalar_select %p1518_p4, 1, 0 }
  0x13   : > { %s1694_s12 = scalar_select %p1523_p6, 1, 0 }
  0x14   : > { %p1528_p8 = pnand %p1005_p5, %p242_p7  ;;  %s1426_s14 = smov [#allocation6]  }
  0x15   : > { %s254_s15 = sshll.u32 %s1426_s14, 4  ;;  %s1427_s17 = smov [#allocation8]   ;;  %s255_s15 = int_to_ptr.vmem [resolvable:$true] %s254_s15 }
  0x16   : > { %s1695_s13 = scalar_select %p1528_p8, 1, 0 }
  0x17   : > { %p1090_p9 = pneg %p1528_p8  ;;  %s273_s18 = sshll.u32 %s1427_s17, 4  ;;  %s274_s18 = int_to_ptr.vmem [resolvable:$true] %s273_s18 }
  0x18   : > { %s1428_s19 = smov [#allocation9]   ;;  %s1241_s21 = scalar_lea.vmem %s255_s15, 512 }
  0x19   : > { %p1537_p11 = pnand %p1090_p9, %p1508_p1  ;;  %s297_s20 = sshll.u32 %s1428_s19, 4  ;;  %s298_s20 = int_to_ptr.vmem [resolvable:$true] %s297_s20 }
  0x1a   : > { %p1242_p13 = scmp.ne.s32.totalorder %s255_s15, %s1241_s21  ;;  %p1249_p5 = scmp.lt.s32.totalorder %s255_s15, %s255_s15 }
  0x1b   : > { %p1232_p12 = pneg %p1537_p11  ;;  %p1250_p7 = scmp.lt.s32.totalorder %s1241_s21, %s1241_s21 }
  0x1d   : > { %p1244_p0 = pnand %p1242_p13, %p1232_p12  ;;  %p1251_p9 = por %p1250_p7, %p1249_p5 }
  0x1f   : > { %p1245_p3 = pneg %p1244_p0 }
  0x21   : > { %p1252_p10 = pnand %p1251_p9, %p1245_p3 }
  0x23   : > { %1255 = shalt.err (!%p1252_p10)
}
  0x24   : > { %s1429_s22 = smov 128   ;;  %s1430_s23 = smov 8  }
  0x25   : > { %s1697_s1 = sld [smem:[#allocation16_spill]]  ;;  %s1267_s14 = scalar_lea.vmem %s274_s18, 512 }
  0x26   : > { %p1268_p6 = scmp.ne.s32.totalorder %s274_s18, %s1267_s14  ;;  %p1275_p1 = scmp.lt.s32.totalorder %s274_s18, %s274_s18 }
  0x27   : > { %p1276_p4 = scmp.lt.s32.totalorder %s1267_s14, %s1267_s14 }
  0x28   : > { %p1270_p13 = pnand %p1268_p6, %p1232_p12 }
  0x29   : > { %p1277_p5 = por %p1276_p4, %p1275_p1 }
  0x2a   : > { %p1271_p0 = pneg %p1270_p13 }
  0x2b   : > { %1093 = dma.hbm_to_vmem [thread:$0]  (!%p1537_p11), %s1697_s1, 512, %s255_s15, [#allocation7], %s1429_s22, %s1429_s22, %s1430_s23  }
  0x2c   : > { %p1278_p3 = pnand %p1277_p5, %p1271_p0 }
  0x2e   : > { %1281 = shalt.err (!%p1278_p3)
}
  0x2f   : > { %s1698_s3 = sld [smem:[#allocation17_spill]]  ;;  %s1293_s15 = scalar_lea.vmem %s298_s20, 4096 }
  0x30   : > { %p1294_p10 = scmp.ne.s32.totalorder %s298_s20, %s1293_s15  ;;  %p1301_p9 = scmp.lt.s32.totalorder %s298_s20, %s298_s20 }
  0x31   : > { %p1302_p13 = scmp.lt.s32.totalorder %s1293_s15, %s1293_s15 }
  0x32   : > { %p1296_p7 = pnand %p1294_p10, %p1232_p12 }
  0x33   : > { %p1303_p8 = por %p1302_p13, %p1301_p9 }
  0x34   : > { %p1297_p6 = pneg %p1296_p7 }
  0x35   : > { %1096 = dma.hbm_to_vmem [thread:$0]  (!%p1537_p11), %s1698_s3, 512, %s274_s18, [#allocation7], %s1429_s22, %s1429_s22, %s1430_s23  }
  0x36   : > { %p1304_p1 = pnand %p1303_p8, %p1297_p6 }
  0x38   : > { %1307 = shalt.err (!%p1304_p1)
}
  0x39   : > { %s1699_s5 = sld [smem:[#allocation18_spill]]  ;;  %s44_s18 = sadd.s32 1, %s1412_s26 }
  0x3a   : > { %s37_s8 = sadd.s32 1, %s1420_s28  ;;  %p51_p4 = scmp.ne.s32.totalorder %s1412_s26, %s1408_s25 }
  0x3b   : > { %p39_p8 = scmp.ge.s32.totalorder %s37_s8, 2  ;;  %p52_p12 = scmp.eq.s32.totalorder %s1424_s29, 0 }
  0x3c   : > { %p1574_p0 = por %p1512_p2, %p51_p4  ;;  %p1111_p5 = scmp.lt.s32.totalorder %s1424_s29, 2 }
  0x3d   : > { %s1713_s8 = smov (%p39_p8, %s37_s8), 0  ;;  %p53_p3 = por %p52_p12, %p51_p4 }
  0x3e   : > { %s319_s14 = sand.u32 1, %s1412_s26   ;;  %s41_s17 = ssub.s32 %s1420_s28, %s1713_s8 }
  0x3f   : > { %1099 = dma.hbm_to_vmem [thread:$0]  (!%p1537_p11), %s1699_s5, 4096, %s298_s20, [#allocation10], %s1429_s22, %s1429_s22, %s1430_s23  }
  0x40   : > { %p42_p10 = scmp.eq.s32.totalorder %s41_s17, 0  ;;  %s1012_s20 = sshll.u32 %s319_s14, 3 }
  0x41   : > { %s1013_s22 = sshll.u32 %s1420_s28, 7  ;;  %s323_s21 = scalar_lea.vmem [#allocation3], %s1012_s20 }
  0x42   : > { %s1586_s23 = scalar_select %p42_p10, %s1412_s26, %s44_s18  }
  0x43   : > { %s328_s10 = scalar_lea.hbm %s1676_s0, %s1013_s22  ;;  %s330_s30 = sshll.u32 %s323_s21, 4  ;;  %s331_s30 = int_to_ptr.vmem [resolvable:$true] %s330_s30 }
  0x44   : > { %p1593_p2 = pnand %p1111_p5, %p53_p3  ;;  %s320_s3 = scalar_lea.sflag [#allocation4], %s319_s14 }
  0x45   : > { %s1321_s17 = scalar_lea.vmem %s331_s30, 128  ;;  %s1431_s18 = smov [#allocation3]  }
  0x46   : > { %p1310_p11 = pneg %p1593_p2  ;;  %p1322_p7 = scmp.ne.s32.totalorder %s331_s30, %s1321_s17 }
  0x47   : > { %s1326_s5 = sshll.u32 %s1431_s18, 4  ;;  %s1327_s5 = int_to_ptr.vmem [resolvable:$false] %s1326_s5 }
  0x48   : > { %p1324_p6 = pnand %p1322_p7, %p1310_p11  ;;  %s1328_s22 = scalar_lea.vmem %s1327_s5, 256 }
  0x49   : > { %p1329_p13 = scmp.lt.s32.totalorder %s331_s30, %s1327_s5  ;;  %p1330_p1 = scmp.lt.s32.totalorder %s1328_s22, %s1321_s17 }
  0x4a   : > { %p1325_p9 = pneg %p1324_p6 }
  0x4b   : > { %p1331_p4 = por %p1330_p1, %p1329_p13 }
  0x4d   : > { %p1332_p8 = pnand %p1331_p4, %p1325_p9 }
  0x4f   : > { %1335 = shalt.err (!%p1332_p8)
}
  0x50   : > { %1103 = dma.hbm_to_vmem [thread:$0]  (!%p1593_p2), %s328_s10, 128, %s331_s30, %s320_s3  }
  0x51   : > { %p1702_p12 = scmp.ne.s32.totalorder %s1695_s13, 0 }
  0x52   : > { %s1604_s14 = sand.u32 (!%p1702_p12), 1, %s1408_s25   ;;  %p1703_p5 = scmp.ne.s32.totalorder (!%p1702_p12), %s1693_s11, 0 }
  0x53   : > { %339 = sbr.rel (%p1702_p12) target bundleno = 519 (0x207), region = 48  ;;  %s1015_s20 = sshll.u32 (!%p1702_p12), %s1604_s14, 3 }
  0x54   : > { %s342_s19 = scalar_lea.sflag (!%p1702_p12), [#allocation4], %s1604_s14  ;;  %s345_s15 = scalar_lea.vmem (!%p1702_p12), [#allocation3], %s1015_s20 }
  0x58   : > { %1387 = dma.done.wait (%p1703_p5), %s342_s19, 128  }
  0x59   : > { %1389 = vsyncadd (%p1703_p5), %s342_s19, 4294967168  ;;  %p1704_p3 = scmp.ne.s32.totalorder %s1691_s9, 0 }
  0x5b   : > { %1391 = dma.done.wait (%p1704_p3), [#allocation7], 1024  }
  0x5c   : > { %1393 = vsyncadd (%p1704_p3), [#allocation7], 4294966272 }
  0x5d   : > { %1395 = dma.done.wait (%p1704_p3), [#allocation10], 4096  }
  0x5e   : > { %1397 = vsyncadd (%p1704_p3), [#allocation10], 4294963200  ;;  %v1432_v0 = vmov 0   ;;  %v1170_v1 = vld [vmem:[#allocation6 + $0x14] ss:$8 sps:$4 sm:$0xff]   ;;  %vm452_vm0 = vcmask 261120   ;;  %v422_v43 = vlaneseq }
  0x5f   : > { %488 = vmatprep.mubr.bf16.mxu1 %v1432_v0  ;;  %v1172_v2 = vld [vmem:[#allocation6 + $0x10] ss:$8 sps:$4 sm:$0xff]   ;;  %468 = vmatprep.subr.bf16.mxu1 %v1170_v1  ;;  %v1173_v3 = vld [vmem:[#allocation6 + $0x4] ss:$8 sps:$4 sm:$0xff]   ;;  %v1175_v4 = vld [vmem:[#allocation6] ss:$8 sps:$4 sm:$0xff]  }
  0x60   : > { %v410_v5 = vld [vmem:[%s345_s15] sm:$0xff]  ;;  %469 = vmatpush1.bf16.msra.mxu1 %v1172_v2  ;;  %v1179_v8 = vld [vmem:[#allocation9 + $0x64] ss:$8 sps:$4 sm:$0xff]   ;;  %v1181_v10 = vld [vmem:[#allocation9 + $0x60] ss:$8 sps:$4 sm:$0xff]   ;;  %v423_v44 = vshrl.u32 %v422_v43, 7 }
  0x61   : > { %v1176_v6 = vld [vmem:[#allocation9 + $0x74] ss:$8 sps:$4 sm:$0xff]   ;;  %470 = vmatprep.subr.bf16.mxu1 %v1173_v3  ;;  %v1178_v7 = vld [vmem:[#allocation9 + $0x70] ss:$8 sps:$4 sm:$0xff]   ;;  %v1620_v9 = vpack.c.bf16 %v410_v5, %v410_v5  ;;  %v1185_v13 = vld [vmem:[#allocation9 + $0x44] ss:$8 sps:$4 sm:$0xff]  }
  0x62   : > { %801 = vmatprep.subr.bf16.mxu0 %v1176_v6  ;;  %v1182_v11 = vld [vmem:[#allocation9 + $0x54] ss:$8 sps:$4 sm:$0xff]   ;;  %v1184_v12 = vld [vmem:[#allocation9 + $0x50] ss:$8 sps:$4 sm:$0xff]   ;;  %v1187_v14 = vld [vmem:[#allocation9 + $0x40] ss:$8 sps:$4 sm:$0xff]  }
  0x63   : > { %802 = vmatpush1.bf16.msra.mxu0 %v1178_v7  ;;  %v1188_v15 = vld [vmem:[#allocation9 + $0x34] ss:$8 sps:$4 sm:$0xff]   ;;  %v1190_v16 = vld [vmem:[#allocation9 + $0x30] ss:$8 sps:$4 sm:$0xff]   ;;  %v1191_v17 = vld [vmem:[#allocation9 + $0x24] ss:$8 sps:$4 sm:$0xff]  }
  0x64   : > { %471 = vmatpush1.bf16.msra.mxu1 %v1175_v4  ;;  %803 = vmatprep.subr.bf16.mxu0 %v1179_v8  ;;  %v1215_v18 = vld [vmem:[#allocation8 + $0x10] ss:$8 sps:$4 sm:$0xff]   ;;  %v1217_v19 = vld [vmem:[#allocation8 + $0x14] ss:$8 sps:$4 sm:$0xff]   ;;  %v1193_v20 = vld [vmem:[#allocation9 + $0x20] ss:$8 sps:$4 sm:$0xff]  }
  0x65   : > { %v1194_v21 = vld [vmem:[#allocation9 + $0x14] ss:$8 sps:$4 sm:$0xff]   ;;  %560 = vmatprep.subr.bf16.mxu1 %v1217_v19  ;;  %v1196_v22 = vld [vmem:[#allocation9 + $0x10] ss:$8 sps:$4 sm:$0xff]   ;;  %v1197_v23 = vld [vmem:[#allocation9 + $0x4] ss:$8 sps:$4 sm:$0xff]  }
  0x66   : > { %v1199_v24 = vld [vmem:[#allocation9] ss:$8 sps:$4 sm:$0xff]   ;;  %v1200_v25 = vld [vmem:[#allocation9 + $0xf4] ss:$8 sps:$4 sm:$0xff]   ;;  %v1202_v26 = vld [vmem:[#allocation9 + $0xf0] ss:$8 sps:$4 sm:$0xff]  }
  0x67   : > { %1024 = vmatmul.mubr.msk.bf16.vlgmr.msra.gmra.mxu1 %vm452_vm0, %v1620_v9  ;;  %804 = vmatpush1.bf16.msra.mxu0 %v1181_v10  ;;  %v1203_v27 = vld [vmem:[#allocation9 + $0xe4] ss:$8 sps:$4 sm:$0xff]   ;;  %v1205_v28 = vld [vmem:[#allocation9 + $0xe0] ss:$8 sps:$4 sm:$0xff]   ;;  %v1206_v29 = vld [vmem:[#allocation9 + $0xd4] ss:$8 sps:$4 sm:$0xff]  }
  0x68   : > { %805 = vmatprep.subr.bf16.mxu0 %v1182_v11  ;;  %580 = vmatprep.mubr.bf16.mxu1 %v1432_v0  ;;  %v1208_v30 = vld [vmem:[#allocation9 + $0xd0] ss:$8 sps:$4 sm:$0xff]   ;;  %v1209_v31 = vld [vmem:[#allocation9 + $0xc4] ss:$8 sps:$4 sm:$0xff]   ;;  %v1211_v32 = vld [vmem:[#allocation9 + $0xc0] ss:$8 sps:$4 sm:$0xff]  }
  0x69   : > { %561 = vmatpush1.bf16.msra.mxu1 %v1215_v18  ;;  %v1212_v33 = vld [vmem:[#allocation9 + $0xb4] ss:$8 sps:$4 sm:$0xff]   ;;  %v1214_v34 = vld [vmem:[#allocation9 + $0xb0] ss:$8 sps:$4 sm:$0xff]   ;;  %v1218_v35 = vld [vmem:[#allocation9 + $0xa4] ss:$8 sps:$4 sm:$0xff]  }
  0x6a   : > { %v1220_v36 = vld [vmem:[#allocation9 + $0xa0] ss:$8 sps:$4 sm:$0xff]   ;;  %v1223_v37 = vld [vmem:[#allocation8 + $0x4] ss:$8 sps:$4 sm:$0xff]   ;;  %v1224_v38 = vld [vmem:[#allocation9 + $0x94] ss:$8 sps:$4 sm:$0xff]  }
  0x6b   : > { %806 = vmatpush1.bf16.msra.mxu0 %v1184_v12  ;;  %v1221_v39 = vld [vmem:[#allocation8] ss:$8 sps:$4 sm:$0xff]   ;;  %v1226_v40 = vld [vmem:[#allocation9 + $0x90] ss:$8 sps:$4 sm:$0xff]   ;;  %562 = vmatprep.subr.bf16.mxu1 %v1223_v37  ;;  %v1227_v41 = vld [vmem:[#allocation9 + $0x84] ss:$8 sps:$4 sm:$0xff]  }
  0x6c   : > { %807 = vmatprep.subr.bf16.mxu0 %v1185_v13  ;;  %v1229_v42 = vld [vmem:[#allocation9 + $0x80] ss:$8 sps:$4 sm:$0xff]   ;;  %v424_v45 = vsub.s32 0, %v423_v44  ;;  %v420_v46 = vld [vmem:[%s1678_s2] sm:$0x3]  ;;  %v428_v47 = vsub.s32 1, %v423_v44 }
  0x6d   : > { %563 = vmatpush1.bf16.msra.mxu1 %v1221_v39  ;;  %v512_v0 = vld [vmem:[%s1680_s4] sm:$0x3]  ;;  %s1019_s10 = sshll.u32 %s1604_s14, 4  ;;  %s1071_s21 = sshll.u32 %s1416_s27, 8 }
  0x6e   : > { %v425_v48 = vrot.slane %v420_v46, %v424_v45  ;;  %v429_v49 = vrot.slane %v420_v46, %v428_v47  ;;  %v622_v1 = vld [vmem:[%s1682_s6] sm:$0x3]  ;;  %v517_v2 = vrot.slane %v512_v0, %v424_v45  ;;  %v521_v7 = vrot.slane %v512_v0, %v428_v47  ;;  %s395_s30 = scalar_lea.vmem [#allocation11], %s1019_s10  ;;  %s863_s20 = scalar_lea.hbm %s1683_s7, %s1071_s21 }
  0x6f   : > { %808 = vmatpush1.bf16.msra.mxu0 %v1187_v14  ;;  %v627_v3 = vrot.slane %v622_v1, %v424_v45  ;;  %v631_v4 = vrot.slane %v622_v1, %v428_v47  ;;  %s865_s17 = sshll.u32 %s395_s30, 4  ;;  %s849_s19 = scalar_lea.sflag [#allocation5], %s1604_s14  ;;  %s866_s17 = int_to_ptr.vmem [resolvable:$true] %s865_s17 }
  0x70   : > { %809 = vmatprep.subr.bf16.mxu0 %v1188_v15  ;;  %1030 = vmatmul.mubr.msk.bf16.vlgmr.msra.gmra.mxu1 %vm452_vm0, %v1620_v9  ;;  %s1336_s15 = scalar_lea.vmem %s866_s17, 256  ;;  %s1433_s27 = smov [#allocation11]  }
  0x71   : > { %p1337_p10 = scmp.ne.s32.totalorder %s866_s17, %s1336_s15  ;;  %s1340_s1 = sshll.u32 %s1433_s27, 4  ;;  %s1341_s1 = int_to_ptr.vmem [resolvable:$false] %s1340_s1 }
  0x72   : > { %s1342_s3 = scalar_lea.vmem %s1341_s1, 512  ;;  %p1343_p7 = scmp.lt.s32.totalorder %s866_s17, %s1341_s1 }
  0x73   : > { %810 = vmatpush1.bf16.msra.mxu0 %v1190_v16  ;;  %p1338_p2 = pnand %p1337_p10, %p1574_p0  ;;  %p1344_p6 = scmp.lt.s32.totalorder %s1342_s3, %s1336_s15 }
  0x74   : > { %811 = vmatprep.subr.bf16.mxu0 %v1191_v17 }
  0x75   : > { %p1339_p11 = pneg %p1338_p2  ;;  %p1345_p9 = por %p1344_p6, %p1343_p7 }
  0x77   : > { %812 = vmatpush1.bf16.msra.mxu0 %v1193_v20  ;;  %p1346_p13 = pnand %p1345_p9, %p1339_p11 }
  0x78   : > { %813 = vmatprep.subr.bf16.mxu0 %v1194_v21 }
  0x7b   : > { %814 = vmatpush1.bf16.msra.mxu0 %v1196_v22 }
  0x7c   : > { %815 = vmatprep.subr.bf16.mxu0 %v1197_v23 }
  0x7f   : > { %816 = vmatpush1.bf16.msra.mxu0 %v1199_v24 }
  0x80   : > { %817 = vmatprep.subr.bf16.mxu0 %v1200_v25 }
  0x83   : > { %818 = vmatpush2.bf16.msra.mxu0 %v1202_v26 }
  0x84   : > { %819 = vmatprep.subr.bf16.mxu0 %v1203_v27 }
  0x87   : > { %820 = vmatpush2.bf16.msra.mxu0 %v1205_v28 }
  0x88   : > { %821 = vmatprep.subr.bf16.mxu0 %v1206_v29 }
  0x8b   : > { %822 = vmatpush2.bf16.msra.mxu0 %v1208_v30 }
  0x8c   : > { %823 = vmatprep.subr.bf16.mxu0 %v1209_v31 }
  0x8f   : > { %824 = vmatpush2.bf16.msra.mxu0 %v1211_v32 }
  0x90   : > { %825 = vmatprep.subr.bf16.mxu0 %v1212_v33 }
  0x93   : > { %826 = vmatpush2.bf16.msra.mxu0 %v1214_v34 }
  0x94   : > { %827 = vmatprep.subr.bf16.mxu0 %v1218_v35 }
  0x97   : > { %828 = vmatpush2.bf16.msra.mxu0 %v1220_v36 }
  0x98   : > { %829 = vmatprep.subr.bf16.mxu0 %v1224_v38 }
  0x9b   : > { %830 = vmatpush2.bf16.msra.mxu0 %v1226_v40 }
  0x9c   : > { %831 = vmatprep.subr.bf16.mxu0 %v1227_v41 }
  0x9f   : > { %832 = vmatpush2.bf16.msra.mxu0 %v1229_v42 }
 0x127   : > { %v490_v50 = vpop.f32.mrf.mxu1 }
 0x128   : > { %v491_v51 = vadd.f32 %v490_v50, %v425_v48 }
 0x129   : > { %v492_v52 = vpop.f32.mrf.mxu1 }
 0x12a   : > { %v493_v53 = vadd.f32 %v492_v52, %v429_v49  ;;  %v497_v54 = vmax.f32 %v491_v51, 0.0 }
 0x12b   : > { %v494_v55 = vpop.f32.mrf.mxu1 }
 0x12c   : > { %v498_v56 = vmax.f32 %v493_v53, 0.0  ;;  %v1072_v59 = vpack.c.bf16 %v497_v54, %v497_v54 }
 0x12d   : > { %v495_v57 = vpop.f32.mrf.mxu1 }
 0x12e   : > { %v1073_v58 = vpack.c.bf16 %v498_v56, %v498_v56 }
 0x130   : > { %833 = vmatprep.mubr.bf16.mxu0 %v1073_v58  ;;  %v582_v60 = vpop.f32.mrf.mxu1 }
 0x131   : > { %834 = vmatmul.mubr.bf16.vlgmr.msra.gmra.mxu0 %v1072_v59  ;;  %v583_v6 = vadd.f32 %v582_v60, %v517_v2 }
 0x132   : > { %v584_v61 = vpop.f32.mrf.mxu1 }
 0x133   : > { %v585_v13 = vadd.f32 %v584_v61, %v521_v7 }
 0x134   : > { %v586_v62 = vpop.f32.mrf.mxu1 }
 0x136   : > { %v587_v63 = vpop.f32.mrf.mxu1 }
 0x1f1   : > { %v835_v5 = vpop.f32.mrf.mxu0 }
 0x1f2   : > { %v836_v8 = vadd.f32 %v835_v5, %v627_v3 }
 0x1f3   : > { %v837_v9 = vpop.f32.mrf.mxu0 }
 0x1f4   : > { %v842_v10 = vmax.f32 %v836_v8, 0.0  ;;  %v838_v11 = vadd.f32 %v837_v9, %v631_v4 }
 0x1f5   : > { %v839_v12 = vpop.f32.mrf.mxu0 }
 0x1f6   : > { %v844_v14 = vadd.f32 %v842_v10, %v583_v6  ;;  %v843_v15 = vmax.f32 %v838_v11, 0.0 }
 0x1f7   : > { %v840_v16 = vpop.f32.mrf.mxu0 }
 0x1f8   : > { %846 = vst [vmem:[%s395_s30] sm:$0xff] %v844_v14  ;;  %v845_v17 = vadd.f32 %v843_v15, %v585_v13 }
 0x1fa   : > { %847 = vst [vmem:[%s395_s30 + $0x8] sm:$0xff] %v845_v17 }
 0x1fb   : > { %1349 = shalt.err (!%p1346_p13)
}
 0x1fc   : > { %s1350_s5 = scalar_lea.hbm %s863_s20, 256  ;;  %s1354_s11 = scalar_lea.hbm %s1683_s7, 512 }
 0x1fd   : > { %p1351_p1 = scmp.ne.s32.totalorder %s863_s20, %s1350_s5  ;;  %p1355_p12 = scmp.lt.s32.totalorder %s863_s20, %s1683_s7 }
 0x1fe   : > { %p1356_p5 = scmp.lt.s32.totalorder %s1354_s11, %s1350_s5 }
 0x1ff   : > { %p1352_p4 = pnand %p1351_p1, %p1574_p0 }
 0x200   : > { %p1357_p3 = por %p1356_p5, %p1355_p12 }
 0x201   : > { %p1353_p8 = pneg %p1352_p4 }
 0x203   : > { %p1358_p10 = pnand %p1357_p3, %p1353_p8 }
 0x205   : > { %1361 = shalt.err (!%p1358_p10)
}
 0x206   : > { %1088 = dma.vmem_to_hbm [thread:$0]  (%p1574_p0), %s866_s17, 256, %s863_s20, %s849_s19  }
 0x207 PF: > { %s877_s21 = sand.u32 1, %s1404_s24   ;;  %p1705_p2 = scmp.ne.s32.totalorder %s1694_s12, 0 }
 0x208   : > { %p1706_p11 = scmp.ge.s32.totalorder %s1424_s29, 2  ;;  %s878_s30 = scalar_lea.sflag [#allocation5], %s877_s21 }
 0x20a   : > { %p1105_p7 = pnand %p1706_p11, %p1705_p2 }
 0x20c   : > { %p1106_p6 = pneg %p1105_p7 }
 0x20e   : > { %1399 = dma.done.wait (%p1106_p6), %s878_s30, 256  }
 0x20f   : > { %1401 = vsyncadd (%p1106_p6), %s878_s30, 4294967040  ;;  %s25_s29 = sadd.s32 1, %s1424_s29   ;;  %s1707_s24 = smov %s1408_s25 }
 0x210   : > { %p22_p9 = scmp.ge.s32.totalorder %s25_s29, 4   ;;  %s1708_s25 = smov %s1412_s26 }
 0x211   : > { %s1709_s26 = smov %s1586_s23  ;;  %s1710_s27 = smov %s1420_s28 }
 0x212   : > { %s1711_s28 = smov %s1713_s8  ;;  %24 = sbr.rel (!%p22_p9) target bundleno = 12 (0xc), region = 117 }
 0x217   :  { %883 = vsyncpa [#allocation4], 1 }
 0x218   :  { %885 = vsyncpa [#allocation4 + $0x1], 1 }
 0x219   :  { %886 = vsyncpa [#allocation7], 1 }
 0x21a   :  { %887 = vsyncpa [#allocation10], 1 }
 0x21b   :  { %888 = vsyncpa [#allocation5], 1 }
 0x21c   :  { %890 = vsyncpa [#allocation5 + $0x1], 1 }

</bundles_post_ra>
